<compile_context>
chip_gen: v7x
topology: tpu7x:2x2x1
jax: 0.10.0
libtpu: 0.0.40
codegen_flags: <defaults>
</compile_context>

<pallas_src>
import functools

import jax
import jax.numpy as jnp
from jax.experimental import pallas as pl
from jax.experimental.pallas import tpu as pltpu

HIDDEN_DIM = 512


def coupling_fwd_kernel(
    x_ref, mask_ref,
    w1_ref, b1_ref,            # fused first layer:  [D, 2H] bf16, [1, 2H] f32
    w2_ref, b2_ref,            # block-diag 2nd layer: [2H, 2D] bf16, [1, 2D] f32
    z_ref, logdet_ref,
):
    """One batch tile of the coupling-layer forward.

    x_ref:      [TM, D] f32 input tile
    mask_ref:   [1, D]  f32 binary mask (broadcast over batch)
    z_ref:      [TM, D] f32 output tile
    logdet_ref: [TM, 1] f32 log-determinant per row
    """
    x = x_ref[...]                       # f32
    mask = mask_ref[...]                 # f32
    inv_mask = 1.0 - mask

    x_masked = x * mask                  # f32 elementwise (VPU)

    D = x_ref.shape[1]

    # Fused first layer (scale || translate along N): one bf16 MXU matmul,
    # f32 accumulation.  [TM, D] @ [D, 2H] -> [TM, 2H]
    h = jnp.dot(x_masked.astype(jnp.bfloat16), w1_ref[...],
                preferred_element_type=jnp.float32) + b1_ref[...]
    h = jnp.maximum(h, 0.0)              # ReLU in f32

    # Block-diagonal fused second layer: one bf16 MXU matmul produces
    # s_raw || t_raw in a single 128-lane group.  [TM, 2H] @ [2H, 2D] -> [TM, 2D]
    st = jnp.dot(h.astype(jnp.bfloat16), w2_ref[...],
                 preferred_element_type=jnp.float32) + b2_ref[...]
    s_raw = st[:, :D]                    # cheap lane-shift (same lane tile)
    t_raw = st[:, D:]

    # Elementwise / transcendental math in f32 (EUP tanh/exp, VPU mul/add).
    s = jnp.tanh(s_raw) * inv_mask
    t = t_raw * inv_mask

    z = x_masked + inv_mask * (x * jnp.exp(s) + t)

    z_ref[...] = z.astype(z_ref.dtype)
    logdet_ref[...] = jnp.sum(s, axis=1, keepdims=True).astype(logdet_ref.dtype)


def pack_coupling_params(params):
    """One-time packing of CouplingLayer params for the kernel.

    Call this ONCE at init (outside the forward path): it concatenates the two
    first-layer weights along N, builds the block-diagonal second-layer weight
    and casts matmul weights to bf16 (biases stay f32).
    """
    D, H = params["w1s"].shape
    Do = params["w2s"].shape[1]

    w1_cat = jnp.concatenate([params["w1s"], params["w1t"]], axis=1).astype(jnp.bfloat16)
    b1_cat = jnp.concatenate([params["b1s"], params["b1t"]], axis=1).astype(jnp.float32)

    # Block-diagonal [2H, 2D]: top-left = w2s, bottom-right = w2t, zeros elsewhere.
    w2_blk = jnp.zeros((2 * H, 2 * Do), jnp.float32)
    w2_blk = w2_blk.at[:H, :Do].set(params["w2s"])
    w2_blk = w2_blk.at[H:, Do:].set(params["w2t"])
    w2_blk = w2_blk.astype(jnp.bfloat16)
    b2_cat = jnp.concatenate([params["b2s"], params["b2t"]], axis=1).astype(jnp.float32)

    return dict(w1=w1_cat, b1=b1_cat, w2=w2_blk, b2=b2_cat)


@functools.partial(jax.jit, static_argnames=("block_batch",))
def coupling_layer_forward(x, mask, packed, block_batch=1024):
    """CouplingLayer.forward.

    x:      [B, D] float32
    mask:   [D]    float32 (0/1)
    packed: output of pack_coupling_params (pre-packed, pre-cast weights)
    Returns (z [B, D], log_det [B]).
    """
    B, D = x.shape
    H2 = packed["w1"].shape[1]           # 2H
    D2 = packed["w2"].shape[1]           # 2D

    # Batch tile: multiple of 8 (sublane), <= block_batch, and sized so the
    # grid has >= 2 steps whenever B > 8 (v7x megacore uses both TCs).
    B8 = ((B + 7) // 8) * 8
    bb8 = max(8, (block_batch // 8) * 8)
    half = ((B8 // 2) // 8) * 8
    TM = max(8, min(bb8, half))
    B_pad = pl.cdiv(B, TM) * TM
    if B_pad != B:
        x = jnp.pad(x, ((0, B_pad - B), (0, 0)))

    mask2d = mask.reshape(1, D).astype(jnp.float32)

    resident = lambda shape: pl.BlockSpec(shape, lambda i: (0, 0))

    z, logdet = pl.pallas_call(
        coupling_fwd_kernel,
        grid=(B_pad // TM,),
        in_specs=[
            pl.BlockSpec((TM, D), lambda i: (i, 0)),     # x tile
            resident((1, D)),                            # mask
            resident((D, H2)),                           # w1_cat   (bf16)
            resident((1, H2)),                           # b1_cat   (f32)
            resident((2 * (H2 // 2), D2)),               # w2 block-diag (bf16)
            resident((1, D2)),                           # b2_cat   (f32)
        ],
        out_specs=(
            pl.BlockSpec((TM, D), lambda i: (i, 0)),     # z tile
            pl.BlockSpec((TM, 1), lambda i: (i, 0)),     # logdet tile
        ),
        out_shape=(
            jax.ShapeDtypeStruct((B_pad, D), x.dtype),
            jax.ShapeDtypeStruct((B_pad, 1), jnp.float32),
        ),
        compiler_params=pltpu.CompilerParams(
            dimension_semantics=("parallel",),
            vmem_limit_bytes=32 * 1024 * 1024),
    )(x, mask2d, packed["w1"], packed["b1"], packed["w2"], packed["b2"])

    return z[:B], logdet[:B, 0]


def init_mlp_params(key, in_dim, hidden_dim, out_dim):
    """Deterministic init mimicking nn.Linear default U(-1/sqrt(fan_in), ...)."""
    k1, k2, k3, k4 = jax.random.split(key, 4)
    bound1 = 1.0 / jnp.sqrt(in_dim)
    bound2 = 1.0 / jnp.sqrt(hidden_dim)
    w1 = jax.random.uniform(k1, (in_dim, hidden_dim), jnp.float32, -bound1, bound1)
    b1 = jax.random.uniform(k2, (1, hidden_dim), jnp.float32, -bound1, bound1)
    w2 = jax.random.uniform(k3, (hidden_dim, out_dim), jnp.float32, -bound2, bound2)
    b2 = jax.random.uniform(k4, (1, out_dim), jnp.float32, -bound2, bound2)
    return w1, b1, w2, b2


def reference_forward(x, mask, params):
    """Pure-JAX reference of CouplingLayer.forward with the same bf16 weight
    quantization as the kernel (f32 accumulation) for a tight check.
    NOTE: the bf16 weight cast is an intentional accuracy tradeoff vs. the f32
    PyTorch module; see the loose f32 check in __main__."""
    f32 = jnp.float32
    xm = x * mask
    xm16 = xm.astype(jnp.bfloat16)
    h_s = jnp.maximum(
        jnp.dot(xm16, params["w1s"].astype(jnp.bfloat16), preferred_element_type=f32)
        + params["b1s"], 0.0)
    s = jnp.tanh(
        jnp.dot(h_s.astype(jnp.bfloat16), params["w2s"].astype(jnp.bfloat16),
                preferred_element_type=f32) + params["b2s"]) * (1.0 - mask)
    h_t = jnp.maximum(
        jnp.dot(xm16, params["w1t"].astype(jnp.bfloat16), preferred_element_type=f32)
        + params["b1t"], 0.0)
    t = (jnp.dot(h_t.astype(jnp.bfloat16), params["w2t"].astype(jnp.bfloat16),
                 preferred_element_type=f32) + params["b2t"]) * (1.0 - mask)
    z = xm + (1.0 - mask) * (x * jnp.exp(s) + t)
    log_det = s.sum(axis=1)
    return z, log_det


def reference_forward_f32(x, mask, params):
    """Full-f32 reference (matches the PyTorch module exactly)."""
    xm = x * mask
    h_s = jnp.maximum(xm @ params["w1s"] + params["b1s"], 0.0)
    s = jnp.tanh(h_s @ params["w2s"] + params["b2s"]) * (1.0 - mask)
    h_t = jnp.maximum(xm @ params["w1t"] + params["b1t"], 0.0)
    t = (h_t @ params["w2t"] + params["b2t"]) * (1.0 - mask)
    z = xm + (1.0 - mask) * (x * jnp.exp(s) + t)
    return z, s.sum(axis=1)


if __name__ == "__main__":
    B, D = 64, 16

    key = jax.random.PRNGKey(0)
    kx, ks, kt = jax.random.split(key, 3)

    x = jax.random.normal(kx, (B, D), jnp.float32)
    # Alternating binary mask over the feature dimension (RealNVP checkerboard).
    mask = (jnp.arange(D) % 2).astype(jnp.float32)

    w1s, b1s, w2s, b2s = init_mlp_params(ks, D, HIDDEN_DIM, D)
    w1t, b1t, w2t, b2t = init_mlp_params(kt, D, HIDDEN_DIM, D)
    params = dict(w1s=w1s, b1s=b1s, w2s=w2s, b2s=b2s,
                  w1t=w1t, b1t=b1t, w2t=w2t, b2t=b2t)

    # Pack/cast weights ONCE (hoisted out of the forward path).
    packed = jax.block_until_ready(pack_coupling_params(params))

    # Default block_batch=1024; TM sizing still yields >= 2 grid steps here.
    z, log_det = coupling_layer_forward(x, mask, packed)
    jax.block_until_ready((z, log_det))

    # Tight check vs. a reference that applies the same bf16 weight quantization.
    z_ref, ld_ref = reference_forward(x, mask.reshape(1, D), params)
    assert jnp.allclose(z, z_ref, atol=2e-3, rtol=2e-3), float(jnp.abs(z - z_ref).max())
    assert jnp.allclose(log_det, ld_ref, atol=2e-3, rtol=2e-3), float(jnp.abs(log_det - ld_ref).max())

    # Loose check vs. the exact f32 PyTorch-equivalent math (documents the
    # bf16-weight accuracy tradeoff).
    z_f32, ld_f32 = reference_forward_f32(x, mask.reshape(1, D), params)
    assert jnp.allclose(z, z_f32, atol=1e-1, rtol=1e-1), float(jnp.abs(z - z_f32).max())
    assert jnp.allclose(log_det, ld_f32, atol=1e-1, rtol=1e-1), float(jnp.abs(log_det - ld_f32).max())

    print("KERNEL_OK")
</pallas_src>

<mosaic_0001>
module attributes {stable_mosaic.version = 11 : i64} {
  func.func @coupling_fwd_kernel(%arg0: i32, %arg1: memref<32x16xf32, #tpu.memory_space<vmem>>, %arg2: memref<1x16xf32, #tpu.memory_space<vmem>>, %arg3: memref<16x1024xbf16, #tpu.memory_space<vmem>>, %arg4: memref<1x1024xf32, #tpu.memory_space<vmem>>, %arg5: memref<1024x32xbf16, #tpu.memory_space<vmem>>, %arg6: memref<1x32xf32, #tpu.memory_space<vmem>>, %arg7: memref<32x16xf32, #tpu.memory_space<vmem>>, %arg8: memref<32x1xf32, #tpu.memory_space<vmem>>) attributes {dimension_semantics = [#tpu.dimension_semantics<parallel>], iteration_bounds = array<i64: 2>, scalar_prefetch = 0 : i64, scratch_operands = 0 : i64, tpu.core_type = #tpu.core_type<tc>, window_params = [{transform_indices = @transform_0, window_bounds = array<i64: 32, 16>}, {pipeline_mode = #tpu.pipeline_mode<synchronous>, transform_indices = @transform_1, window_bounds = array<i64: 1, 16>}, {pipeline_mode = #tpu.pipeline_mode<synchronous>, transform_indices = @transform_2, window_bounds = array<i64: 16, 1024>}, {pipeline_mode = #tpu.pipeline_mode<synchronous>, transform_indices = @transform_3, window_bounds = array<i64: 1, 1024>}, {pipeline_mode = #tpu.pipeline_mode<synchronous>, transform_indices = @transform_4, window_bounds = array<i64: 1024, 32>}, {pipeline_mode = #tpu.pipeline_mode<synchronous>, transform_indices = @transform_5, window_bounds = array<i64: 1, 32>}, {transform_indices = @transform_6, window_bounds = array<i64: 32, 16>}, {transform_indices = @transform_7, window_bounds = array<i64: 32, 1>}]} {
    %c0 = arith.constant 0 : index
    %c0_0 = arith.constant 0 : index
    %0 = vector.load %arg1[%c0, %c0_0] : memref<32x16xf32, #tpu.memory_space<vmem>>, vector<32x16xf32>
    %c0_1 = arith.constant 0 : index
    %c0_2 = arith.constant 0 : index
    %1 = vector.load %arg2[%c0_1, %c0_2] : memref<1x16xf32, #tpu.memory_space<vmem>>, vector<1x16xf32>
    %cst = arith.constant 1.000000e+00 : f32
    %2 = vector.broadcast %cst : f32 to vector<1x16xf32>
    %3 = arith.subf %2, %1 : vector<1x16xf32>
    %4 = vector.broadcast %1 : vector<1x16xf32> to vector<32x16xf32>
    %5 = arith.mulf %0, %4 : vector<32x16xf32>
    %6 = arith.truncf %5 : vector<32x16xf32> to vector<32x16xbf16>
    %c0_3 = arith.constant 0 : index
    %c0_4 = arith.constant 0 : index
    %7 = vector.load %arg3[%c0_3, %c0_4] : memref<16x1024xbf16, #tpu.memory_space<vmem>>, vector<16x1024xbf16>
    %cst_5 = arith.constant dense<0.000000e+00> : vector<32x1024xf32>
    %8 = tpu.matmul %6, %7, %cst_5 {dimension_numbers = #tpu.dot_dimension_numbers<[1], [0], [0], [1], [0, 0, 1, 1], [], []>} : vector<32x16xbf16>, vector<16x1024xbf16>, vector<32x1024xf32> -> vector<32x1024xf32>
    %c0_6 = arith.constant 0 : index
    %c0_7 = arith.constant 0 : index
    %9 = vector.load %arg4[%c0_6, %c0_7] : memref<1x1024xf32, #tpu.memory_space<vmem>>, vector<1x1024xf32>
    %10 = vector.broadcast %9 : vector<1x1024xf32> to vector<32x1024xf32>
    %11 = arith.addf %8, %10 : vector<32x1024xf32>
    %cst_8 = arith.constant 0.000000e+00 : f32
    %12 = vector.broadcast %cst_8 : f32 to vector<32x1024xf32>
    %13 = arith.maximumf %11, %12 : vector<32x1024xf32>
    %14 = arith.truncf %13 : vector<32x1024xf32> to vector<32x1024xbf16>
    %c0_9 = arith.constant 0 : index
    %c0_10 = arith.constant 0 : index
    %15 = vector.load %arg5[%c0_9, %c0_10] : memref<1024x32xbf16, #tpu.memory_space<vmem>>, vector<1024x32xbf16>
    %cst_11 = arith.constant dense<0.000000e+00> : vector<32x32xf32>
    %16 = tpu.matmul %14, %15, %cst_11 {dimension_numbers = #tpu.dot_dimension_numbers<[1], [0], [0], [1], [0, 0, 1, 1], [], []>} : vector<32x1024xbf16>, vector<1024x32xbf16>, vector<32x32xf32> -> vector<32x32xf32>
    %c0_12 = arith.constant 0 : index
    %c0_13 = arith.constant 0 : index
    %17 = vector.load %arg6[%c0_12, %c0_13] : memref<1x32xf32, #tpu.memory_space<vmem>>, vector<1x32xf32>
    %18 = vector.broadcast %17 : vector<1x32xf32> to vector<32x32xf32>
    %19 = arith.addf %16, %18 : vector<32x32xf32>
    %20 = vector.extract_strided_slice %19 {offsets = [0, 0], sizes = [32, 16], strides = [1, 1]} : vector<32x32xf32> to vector<32x16xf32>
    %21 = vector.extract_strided_slice %19 {offsets = [0, 16], sizes = [32, 16], strides = [1, 1]} : vector<32x32xf32> to vector<32x16xf32>
    %22 = math.tanh %20 : vector<32x16xf32>
    %23 = vector.broadcast %3 : vector<1x16xf32> to vector<32x16xf32>
    %24 = arith.mulf %22, %23 : vector<32x16xf32>
    %25 = vector.broadcast %3 : vector<1x16xf32> to vector<32x16xf32>
    %26 = arith.mulf %21, %25 : vector<32x16xf32>
    %27 = math.exp %24 : vector<32x16xf32>
    %28 = arith.mulf %0, %27 : vector<32x16xf32>
    %29 = arith.addf %28, %26 : vector<32x16xf32>
    %30 = vector.broadcast %3 : vector<1x16xf32> to vector<32x16xf32>
    %31 = arith.mulf %30, %29 : vector<32x16xf32>
    %32 = arith.addf %5, %31 : vector<32x16xf32>
    %c0_14 = arith.constant 0 : index
    %c0_15 = arith.constant 0 : index
    %33 = vector.load %arg7[%c0_14, %c0_15] : memref<32x16xf32, #tpu.memory_space<vmem>>, vector<32x16xf32>
    tpu.vector_store %arg7[%c0_14, %c0_15], %32 {strides = array<i32>} : memref<32x16xf32, #tpu.memory_space<vmem>>, vector<32x16xf32>,
    %cst_16 = arith.constant dense<0.000000e+00> : vector<32xf32>
    %34 = vector.multi_reduction <add>, %24, %cst_16 [1] : vector<32x16xf32> to vector<32xf32>
    %35 = vector.shape_cast %34 : vector<32xf32> to vector<32x1xf32>
    %c0_17 = arith.constant 0 : index
    %c0_18 = arith.constant 0 : index
    %36 = vector.load %arg8[%c0_17, %c0_18] : memref<32x1xf32, #tpu.memory_space<vmem>>, vector<32x1xf32>
    tpu.vector_store %arg8[%c0_17, %c0_18], %35 {strides = array<i32>} : memref<32x1xf32, #tpu.memory_space<vmem>>, vector<32x1xf32>,
    return
  }
  func.func @transform_0(%arg0: i32) -> (i32, i32) {
    %c0_i32 = arith.constant 0 : i32
    %c0_i32_0 = arith.constant 0 : i32
    return %arg0, %c0_i32 : i32, i32
  }
  func.func @transform_1(%arg0: i32) -> (i32, i32) {
    %c0_i32 = arith.constant 0 : i32
    %c0_i32_0 = arith.constant 0 : i32
    %c0_i32_1 = arith.constant 0 : i32
    return %c0_i32, %c0_i32_0 : i32, i32
  }
  func.func @transform_2(%arg0: i32) -> (i32, i32) {
    %c0_i32 = arith.constant 0 : i32
    %c0_i32_0 = arith.constant 0 : i32
    %c0_i32_1 = arith.constant 0 : i32
    return %c0_i32, %c0_i32_0 : i32, i32
  }
  func.func @transform_3(%arg0: i32) -> (i32, i32) {
    %c0_i32 = arith.constant 0 : i32
    %c0_i32_0 = arith.constant 0 : i32
    %c0_i32_1 = arith.constant 0 : i32
    return %c0_i32, %c0_i32_0 : i32, i32
  }
  func.func @transform_4(%arg0: i32) -> (i32, i32) {
    %c0_i32 = arith.constant 0 : i32
    %c0_i32_0 = arith.constant 0 : i32
    %c0_i32_1 = arith.constant 0 : i32
    return %c0_i32, %c0_i32_0 : i32, i32
  }
  func.func @transform_5(%arg0: i32) -> (i32, i32) {
    %c0_i32 = arith.constant 0 : i32
    %c0_i32_0 = arith.constant 0 : i32
    %c0_i32_1 = arith.constant 0 : i32
    return %c0_i32, %c0_i32_0 : i32, i32
  }
  func.func @transform_6(%arg0: i32) -> (i32, i32) {
    %c0_i32 = arith.constant 0 : i32
    %c0_i32_0 = arith.constant 0 : i32
    return %arg0, %c0_i32 : i32, i32
  }
  func.func @transform_7(%arg0: i32) -> (i32, i32) {
    %c0_i32 = arith.constant 0 : i32
    %c0_i32_0 = arith.constant 0 : i32
    return %arg0, %c0_i32 : i32, i32
  }
}

</mosaic_0001>

<bundles_post_ra>
// kernel: coupling_layer_forward.1
= control target key start
LH: loop header
LB: loop body
LE: loop exit
PB: predicated region body
PF: predicated region fallthrough
CT: control target
= control target key end

     0   :  { %s1911_s24 = smov 0   ;;  %s2295_s0 = inlined_call_operand.vmem [shape: f32[64,16], index: 0, kind: input, shape index: {}]   ;;  %s2296_s1 = inlined_call_operand.vmem [shape: f32[1,16], index: 1, kind: input, shape index: {}]   ;;  %s2297_s2 = inlined_call_operand.vmem [shape: bf16[16,1024], index: 2, kind: input, shape index: {}]   ;;  %s2298_s3 = inlined_call_operand.vmem [shape: f32[1,1024], index: 3, kind: input, shape index: {}]   ;;  %s2299_s4 = inlined_call_operand.vmem [shape: bf16[1024,32], index: 4, kind: input, shape index: {}]   ;;  %s2300_s5 = inlined_call_operand.vmem [shape: f32[1,32], index: 5, kind: input, shape index: {}]   ;;  %s2301_s6 = inlined_call_operand.vmem [shape: f32[64,16], index: 6, kind: output, shape index: {0}]   ;;  %s2302_s7 = inlined_call_operand.vmem [shape: f32[64,1], index: 7, kind: output, shape index: {1}]  }
   0x1 LB: > { %s1559_s25 = sadd.s32 4294967295, %s1866_s24   ;;  %p1563_p0 = scmp.ge.s32.totalorder %s1866_s24, 1  ;;  %s1866_s24 = sphi %s1911_s24, %s18_s24  }
   0x2   : > { %p241_p1 = scmp.lt.s32.totalorder %s1866_s24, 3 }
   0x4   : > { %p242_p2 = pnand %p1563_p0, %p241_p1 }
   0x5   : > { %v315_v0 = vld [vmem:[%s2297_s2] sm:$0xff] (!%p242_p2)  ;;  %v316_v2 = vld [vmem:[%s2297_s2 + $0x8] sm:$0xff] (!%p242_p2)  ;;  %s1564_s9 = sshll.u32 (!%p242_p2), %s1559_s25, 2  ;;  %v304_v3 = vlaneseq (!%p242_p2)  ;;  %v1868_v7 = vmov (!%p242_p2), 0   ;;  %v317_v9 = vld [vmem:[%s2297_s2 + $0x10] sm:$0xff] (!%p242_p2)  ;;  %vm405_vm0 = vcmask (!%p242_p2), 130048  }
   0x6   : > { %245 = sbr.rel (%p242_p2) target bundleno = 697 (0x2b9), region = 44  ;;  %v319_v1 = vld [vmem:[%s2297_s2 + $0x20] sm:$0xff] (!%p242_p2)  ;;  %v320_v5 = vld [vmem:[%s2297_s2 + $0x28] sm:$0xff] (!%p242_p2)  ;;  %444 = vmatprep.mubr.bf16.mxu0 (!%p242_p2), %v1868_v7  ;;  %497 = vmatprep.mubr.bf16.mxu1 (!%p242_p2), %v1868_v7  ;;  %p279_p3 = scmp.lt.s32.totalorder (!%p242_p2), %s1564_s9, 7  ;;  %v321_v14 = vld [vmem:[%s2297_s2 + $0x30] sm:$0xff] (!%p242_p2)  ;;  %vm1464_vm1 = vcmask (!%p242_p2), 7168  }
   0x7   : > { %v1571_v4 = vcombine.high (!%p242_p2), %v315_v0, %v319_v1  ;;  %v1570_v6 = vcombine.low (!%p242_p2), %v315_v0, %v319_v1  ;;  %v301_v8 = vld [vmem:[%s2296_s1] sm:$0x1] (!%p242_p2)  ;;  %v1573_v10 = vcombine.high (!%p242_p2), %v316_v2, %v320_v5  ;;  %v1572_v11 = vcombine.low (!%p242_p2), %v316_v2, %v320_v5  ;;  %v318_v15 = vld [vmem:[%s2297_s2 + $0x18] sm:$0xff] (!%p242_p2)  ;;  %v1780_v38 = vld [vmem:[%s2299_s4 + $0x48] sm:$0xff] (!%p242_p2)   ;;  %s1869_s12 = smov (!%p242_p2), 16   ;;  %s1870_s17 = smov (!%p242_p2), 112  }
   0x8   : > { %v302_v12 = vsub.f32 (!%p242_p2), 1.0, %v301_v8  ;;  %v1937_v13 = vshrl.u32 (!%p242_p2), %v304_v3, 7  ;;  %v322_v16 = vld [vmem:[%s2297_s2 + $0x38] sm:$0xff] (!%p242_p2)  ;;  %v1575_v17 = vcombine.high (!%p242_p2), %v317_v9, %v321_v14  ;;  %v1574_v27 = vcombine.low (!%p242_p2), %v317_v9, %v321_v14  ;;  %v1776_v31 = vld [vmem:[%s2299_s4 + $0x40] sm:$0xff] (!%p242_p2)   ;;  %v1781_v39 = vld [vmem:[%s2299_s4 + $0xc8] sm:$0xff] (!%p242_p2)  }
   0x9   : > { %412 = vmatprep.subr.bf16.mxu0 (!%p242_p2), %v1571_v4  ;;  %v1577_v18 = vcombine.high (!%p242_p2), %v318_v15, %v322_v16  ;;  %465 = vmatprep.subr.bf16.mxu1 (!%p242_p2), %v1573_v10  ;;  %v1576_v30 = vcombine.low (!%p242_p2), %v318_v15, %v322_v16  ;;  %v1777_v32 = vld [vmem:[%s2299_s4 + $0xc0] sm:$0xff] (!%p242_p2)   ;;  %v1782_v40 = vld [vmem:[%s2299_s4 + $0x8] sm:$0xff] (!%p242_p2)   ;;  %v1784_v42 = vld [vmem:[%s2299_s4 + $0x50] sm:$0xff] (!%p242_p2)  }
   0xa   : > { %413 = vmatpush1.bf16.msra.mxu0 (!%p242_p2), %v1570_v6  ;;  %v1949_v19 = vsub.s32 (!%p242_p2), 0, %v1937_v13  ;;  %466 = vmatpush1.bf16.msra.mxu1 (!%p242_p2), %v1572_v11  ;;  %v1778_v36 = vld [vmem:[%s2299_s4] sm:$0xff] (!%p242_p2)   ;;  %v1783_v41 = vld [vmem:[%s2299_s4 + $0x88] sm:$0xff] (!%p242_p2)   ;;  %v1785_v43 = vld [vmem:[%s2299_s4 + $0xd0] sm:$0xff] (!%p242_p2)   ;;  %v335_v4 = vsub.s32 (!%p242_p2), 2, %v1937_v13  ;;  %v331_v6 = vsub.s32 (!%p242_p2), 1, %v1937_v13 }
   0xb   : > { %518 = vmatprep.subr.bf16.mxu0 (!%p242_p2), %v1575_v17  ;;  %571 = vmatprep.subr.bf16.mxu1 (!%p242_p2), %v1577_v18  ;;  %v1779_v37 = vld [vmem:[%s2299_s4 + $0x80] sm:$0xff] (!%p242_p2)   ;;  %v1786_v44 = vld [vmem:[%s2299_s4 + $0x10] sm:$0xff] (!%p242_p2)   ;;  %v1788_v46 = vld [vmem:[%s2299_s4 + $0x58] sm:$0xff] (!%p242_p2)  }
   0xc   : > { %v307_v20 = vrot.slane (!%p242_p2), %v301_v8, %v1949_v19  ;;  %v1961_v21 = vrot.slane (!%p242_p2), %v302_v12, %v1949_v19  ;;  %v1787_v45 = vld [vmem:[%s2299_s4 + $0x90] sm:$0xff] (!%p242_p2)   ;;  %v1789_v47 = vld [vmem:[%s2299_s4 + $0xd8] sm:$0xff] (!%p242_p2)   ;;  %v1792_v50 = vld [vmem:[%s2299_s4 + $0x60] sm:$0xff] (!%p242_p2)  }
   0xd   : > { %s2304_s9 = smov (!%p279_p3, %s1564_s9), 7  ;;  %v1790_v48 = vld [vmem:[%s2299_s4 + $0x18] sm:$0xff]   ;;  %v1793_v51 = vld [vmem:[%s2299_s4 + $0xe0] sm:$0xff]   ;;  %v1796_v54 = vld [vmem:[%s2299_s4 + $0x68] sm:$0xff]  }
   0xe   : > { %s1951_s22 = sshll.u32 %s2304_s9, 3  ;;  %v1791_v49 = vld [vmem:[%s2299_s4 + $0x98] sm:$0xff]   ;;  %v1794_v52 = vld [vmem:[%s2299_s4 + $0x20] sm:$0xff]   ;;  %v1797_v55 = vld [vmem:[%s2299_s4 + $0xe8] sm:$0xff]   ;;  %1401 = vrot.lane.b32.xlu0 %v1961_v21, %s1869_s12 }
   0xf   : > { %s1957_s26 = scalar_lea.vmem %s2295_s0, %s1951_s22  ;;  %v1795_v53 = vld [vmem:[%s2299_s4 + $0xa0] sm:$0xff]   ;;  %v1798_v56 = vld [vmem:[%s2299_s4 + $0x28] sm:$0xff]   ;;  %v1800_v58 = vld [vmem:[%s2299_s4 + $0x70] sm:$0xff]   ;;  %s2265_s20 = scalar_lea.vmem %s2301_s6, %s1951_s22 }
  0x10   : > { %v297_v22 = vld [vmem:[%s1957_s26] sm:$0xff]  ;;  %v298_v23 = vld [vmem:[%s1957_s26 + $0x8] sm:$0xff]  ;;  %v299_v26 = vld [vmem:[%s1957_s26 + $0x10] sm:$0xff]  ;;  %s294_s25 = scalar_lea.vmem %s2302_s7, %s1951_s22 }
  0x11   : > { %v1965_v24 = vmul.f32 %v307_v20, %v297_v22  ;;  %v1967_v25 = vmul.f32 %v307_v20, %v298_v23  ;;  %v300_v28 = vld [vmem:[%s1957_s26 + $0x18] sm:$0xff]  ;;  %v1981_v33 = vmul.f32 %v307_v20, %v299_v26  ;;  %v1799_v57 = vld [vmem:[%s2299_s4 + $0xa8] sm:$0xff]   ;;  %v1801_v59 = vld [vmem:[%s2299_s4 + $0xf0] sm:$0xff]  }
  0x12   : > { %v1983_v34 = vmul.f32 %v307_v20, %v300_v28  ;;  %v1802_v60 = vld [vmem:[%s2299_s4 + $0x30] sm:$0xff]   ;;  %v1804_v62 = vld [vmem:[%s2299_s4 + $0x78] sm:$0xff]   ;;  %v1808_v2 = vld [vmem:[%s2299_s4 + $0x140] sm:$0xff]  }
  0x13   : > { %v313_v29 = vpack.c.bf16 %v1967_v25, %v1965_v24  ;;  %v1803_v61 = vld [vmem:[%s2299_s4 + $0xb0] sm:$0xff]   ;;  %v1805_v63 = vld [vmem:[%s2299_s4 + $0xf8] sm:$0xff]   ;;  %v1809_v3 = vld [vmem:[%s2299_s4 + $0x1c0] sm:$0xff]  }
  0x14   : > { %v314_v35 = vpack.c.bf16 %v1983_v34, %v1981_v33  ;;  %v1806_v0 = vld [vmem:[%s2299_s4 + $0x38] sm:$0xff]   ;;  %v2094_v5 = vld [vmem:[%s2298_s3] sm:$0xff] }
  0x15   : > { %1578 = vmatmul.mubr.msk.bf16.vlgmr.msra.gmra.mrb[0].mxu0 %vm405_vm0, %v313_v29  ;;  %1580 = vmatmul.mubr.msk.bf16.vlgmr.msra.gmra.mrb[0].mxu1 %vm405_vm0, %v313_v29  ;;  %v1807_v1 = vld [vmem:[%s2299_s4 + $0xb8] sm:$0xff]   ;;  %v328_v8 = vrot.slane %v2094_v5, %v1949_v19  ;;  %v336_v9 = vrot.slane %v2094_v5, %v335_v4  ;;  %v2102_v10 = vrot.slane %v2094_v5, %v331_v6 }
  0x16   : > { %454 = vmatprep.mubr.bf16.mxu0 %v1868_v7  ;;  %519 = vmatpush1.bf16.msra.mxu0 %v1574_v27 }
  0x17   : > { %507 = vmatprep.mubr.bf16.mxu1 %v1868_v7  ;;  %572 = vmatpush1.bf16.msra.mxu1 %v1576_v30 }
  0x18   : > { %1653 = vmatprep.subr.bf16.mxu0 %v1776_v31  ;;  %1681 = vmatprep.subr.bf16.mxu1 %v1777_v32 }
  0x1d   : > { %1579 = vmatmul.mubr.msk.bf16.gmra.mrb[4].mxu0 %vm405_vm0, %v314_v35  ;;  %1581 = vmatmul.mubr.msk.bf16.gmra.mrb[4].mxu1 %vm405_vm0, %v314_v35 }
  0x1e   : > { %550 = vmatprep.mubr.bf16.mxu0 %v1868_v7  ;;  %603 = vmatprep.mubr.bf16.mxu1 %v1868_v7 }
  0x25   : > { %1582 = vmatmul.mubr.msk.bf16.vlgmr.msra.gmra.mrb[8].mxu0 %vm405_vm0, %v313_v29  ;;  %1584 = vmatmul.mubr.msk.bf16.vlgmr.msra.gmra.mrb[8].mxu1 %vm405_vm0, %v313_v29 }
  0x26   : > { %560 = vmatprep.mubr.bf16.mxu0 %v1868_v7  ;;  %613 = vmatprep.mubr.bf16.mxu1 %v1868_v7  ;;  %v339_v7 = vsub.s32 3, %v1937_v13 }
  0x27   : > { %1654 = vmatpush3.bf16.msra.mxu0 %v1778_v36  ;;  %1682 = vmatpush3.bf16.msra.mxu1 %v1779_v37 }
  0x28   : > { %1655 = vmatprep.subr.bf16.mxu0 %v1780_v38  ;;  %1683 = vmatprep.subr.bf16.mxu1 %v1781_v39  ;;  %v2105_v11 = vrot.slane %v2094_v5, %v339_v7  ;;  %v1814_v7 = vld [vmem:[%s2299_s4 + $0x108] sm:$0xff]  }
  0x2b   : > { %1656 = vmatpush3.bf16.msra.mxu0 %v1782_v40  ;;  %1684 = vmatpush3.bf16.msra.mxu1 %v1783_v41 }
  0x2c   : > { %1657 = vmatprep.subr.bf16.mxu0 %v1784_v42  ;;  %1685 = vmatprep.subr.bf16.mxu1 %v1785_v43 }
  0x2d   : > { %1583 = vmatmul.mubr.msk.bf16.gmra.mrb[12].mxu0 %vm405_vm0, %v314_v35  ;;  %1585 = vmatmul.mubr.msk.bf16.gmra.mrb[12].mxu1 %vm405_vm0, %v314_v35 }
  0x2f   : > { %1658 = vmatpush3.bf16.msra.mxu0 %v1786_v44  ;;  %1686 = vmatpush3.bf16.msra.mxu1 %v1787_v45 }
  0x30   : > { %1659 = vmatprep.subr.bf16.mxu0 %v1788_v46  ;;  %1687 = vmatprep.subr.bf16.mxu1 %v1789_v47  ;;  %v1810_v46 = vld [vmem:[%s2299_s4 + $0x100] sm:$0xff]  }
  0x31   : > { %v1811_v47 = vld [vmem:[%s2299_s4 + $0x180] sm:$0xff]  }
  0x33   : > { %1660 = vmatpush3.bf16.msra.mxu0 %v1790_v48  ;;  %1688 = vmatpush3.bf16.msra.mxu1 %v1791_v49 }
  0x34   : > { %1661 = vmatprep.subr.bf16.mxu0 %v1792_v50  ;;  %1689 = vmatprep.subr.bf16.mxu1 %v1793_v51  ;;  %v1812_v50 = vld [vmem:[%s2299_s4 + $0x148] sm:$0xff]  }
  0x35   : > { %v1813_v51 = vld [vmem:[%s2299_s4 + $0x1c8] sm:$0xff]  }
  0x37   : > { %1662 = vmatpush3.bf16.msra.mxu0 %v1794_v52  ;;  %1690 = vmatpush3.bf16.msra.mxu1 %v1795_v53 }
  0x38   : > { %1663 = vmatprep.subr.bf16.mxu0 %v1796_v54  ;;  %1691 = vmatprep.subr.bf16.mxu1 %v1797_v55 }
  0x3b   : > { %1664 = vmatpush3.bf16.msra.mxu0 %v1798_v56  ;;  %1692 = vmatpush3.bf16.msra.mxu1 %v1799_v57  ;;  %v343_v56 = vsub.s32 4, %v1937_v13  ;;  %v351_v57 = vsub.s32 6, %v1937_v13 }
  0x3c   : > { %1665 = vmatprep.subr.bf16.mxu0 %v1800_v58  ;;  %1693 = vmatprep.subr.bf16.mxu1 %v1801_v59 }
  0x3f   : > { %1666 = vmatpush3.bf16.msra.mxu0 %v1802_v60  ;;  %1694 = vmatpush3.bf16.msra.mxu1 %v1803_v61 }
  0x40   : > { %1667 = vmatprep.subr.bf16.mxu0 %v1804_v62  ;;  %1695 = vmatprep.subr.bf16.mxu1 %v1805_v63  ;;  %v347_v62 = vsub.s32 5, %v1937_v13  ;;  %v355_v63 = vsub.s32 7, %v1937_v13 }
  0x43   : > { %1668 = vmatpush3.bf16.msra.mxu0 %v1806_v0  ;;  %1696 = vmatpush3.bf16.msra.mxu1 %v1807_v1 }
  0x44   : > { %1709 = vmatprep.subr.bf16.mxu0 %v1808_v2  ;;  %1737 = vmatprep.subr.bf16.mxu1 %v1809_v3 }
  0xe8   : > { %v446_v12 = vpop.f32.mrb[0].mxu0  ;;  %v499_v14 = vpop.f32.mrb[0].mxu1 }
  0xe9   : > { %v447_v15 = vadd.f32 %v446_v12, %v328_v8  ;;  %v500_v16 = vadd.f32 %v499_v14, %v336_v9  ;;  %v448_v17 = vpop.f32.mrb[1].mxu0  ;;  %v501_v18 = vpop.f32.mrb[1].mxu1  ;;  %v1815_v12 = vld [vmem:[%s2299_s4 + $0x188] sm:$0xff]  }
  0xea   : > { %v449_v20 = vadd.f32 %v448_v17, %v2102_v10  ;;  %v502_v22 = vadd.f32 %v501_v18, %v2105_v11  ;;  %v450_v23 = vpop.f32.mrb[2].mxu0  ;;  %v503_v19 = vpop.f32.mrb[2].mxu1  ;;  %v1817_v17 = vld [vmem:[%s2299_s4 + $0x1d0] sm:$0xff]  }
  0xeb   : > { %v626_v26 = vmax.f32 %v500_v16, 0.0  ;;  %v451_v27 = vadd.f32 %v450_v23, %v328_v8  ;;  %v504_v28 = vadd.f32 %v503_v19, %v336_v9  ;;  %v452_v29 = vpop.f32.mrb[3].mxu0  ;;  %v505_v30 = vpop.f32.mrb[3].mxu1  ;;  %v624_v36 = vmax.f32 %v447_v15, 0.0  ;;  %v1816_v16 = vld [vmem:[%s2299_s4 + $0x150] sm:$0xff]  }
  0xec   : > { %v627_v31 = vmax.f32 %v502_v22, 0.0  ;;  %v453_v32 = vadd.f32 %v452_v29, %v2102_v10  ;;  %v506_v35 = vadd.f32 %v505_v30, %v2105_v11  ;;  %v625_v39 = vmax.f32 %v449_v20, 0.0  ;;  %v1818_v29 = vld [vmem:[%s2299_s4 + $0x110] sm:$0xff]  }
  0xed   : > { %v632_v37 = vmax.f32 %v451_v27, 0.0  ;;  %v634_v38 = vmax.f32 %v504_v28, 0.0  ;;  %v2144_v20 = vrot.slane %v2094_v5, %v343_v56  ;;  %v2150_v23 = vrot.slane %v2094_v5, %v347_v62  ;;  %v1819_v30 = vld [vmem:[%s2299_s4 + $0x190] sm:$0xff]  }
  0xee   : > { %v633_v40 = vmax.f32 %v453_v32, 0.0  ;;  %v635_v41 = vmax.f32 %v506_v35, 0.0  ;;  %v2153_v19 = vrot.slane %v2094_v5, %v355_v63 }
  0xef   : > { %v656_v42 = vpack.c.bf16 %v632_v37, %v624_v36  ;;  %v658_v43 = vpack.c.bf16 %v634_v38, %v626_v26  ;;  %v1821_v36 = vld [vmem:[%s2299_s4 + $0x1d8] sm:$0xff]  }
  0xf0   : > { %v657_v44 = vpack.c.bf16 %v633_v40, %v625_v39  ;;  %v659_v45 = vpack.c.bf16 %v635_v41, %v627_v31  ;;  %v456_v48 = vpop.f32.mrb[4].mxu0  ;;  %v509_v49 = vpop.f32.mrb[4].mxu1 }
  0xf1   : > { %v457_v52 = vadd.f32 %v456_v48, %v328_v8  ;;  %v458_v53 = vpop.f32.mrb[5].mxu0  ;;  %v510_v54 = vadd.f32 %v509_v49, %v336_v9  ;;  %v511_v55 = vpop.f32.mrb[5].mxu1 }
  0xf2   : > { %1223 = vmatprep.mubr.bf16.mxu0 %v657_v44  ;;  %1272 = vmatprep.mubr.bf16.mxu1 %v659_v45  ;;  %v459_v58 = vadd.f32 %v458_v53, %v2102_v10  ;;  %v460_v59 = vpop.f32.mrb[6].mxu0  ;;  %v512_v60 = vadd.f32 %v511_v55, %v2105_v11  ;;  %v513_v61 = vpop.f32.mrb[6].mxu1 }
  0xf3   : > { %1224 = vmatmul.mubr.bf16.vlgmr.msra.gmra.mrb[16].mxu0 %v656_v42  ;;  %1273 = vmatmul.mubr.bf16.vlgmr.msra.gmra.mrb[16].mxu1 %v658_v43  ;;  %v640_v0 = vmax.f32 %v457_v52, 0.0  ;;  %v461_v1 = vadd.f32 %v460_v59, %v328_v8  ;;  %v642_v2 = vmax.f32 %v510_v54, 0.0  ;;  %v462_v3 = vpop.f32.mrb[7].mxu0  ;;  %v514_v4 = vadd.f32 %v513_v61, %v336_v9  ;;  %v515_v6 = vpop.f32.mrb[7].mxu1  ;;  %v1823_v52 = vld [vmem:[%s2299_s4 + $0x198] sm:$0xff]  }
  0xf4   : > { %1710 = vmatpush3.bf16.msra.mxu0 %v1810_v46  ;;  %1738 = vmatpush3.bf16.msra.mxu1 %v1811_v47  ;;  %v641_v14 = vmax.f32 %v459_v58, 0.0  ;;  %v463_v13 = vadd.f32 %v462_v3, %v2102_v10  ;;  %v643_v15 = vmax.f32 %v512_v60, 0.0  ;;  %v516_v8 = vadd.f32 %v515_v6, %v2105_v11  ;;  %v1825_v58 = vld [vmem:[%s2299_s4 + $0x1e0] sm:$0xff]  }
  0xf5   : > { %1711 = vmatprep.subr.bf16.mxu0 %v1812_v50  ;;  %1739 = vmatprep.subr.bf16.mxu1 %v1813_v51  ;;  %v648_v9 = vmax.f32 %v461_v1, 0.0  ;;  %v650_v18 = vmax.f32 %v514_v4, 0.0  ;;  %v2147_v10 = vrot.slane %v2094_v5, %v351_v57  ;;  %v1820_v5 = vld [vmem:[%s2299_s4 + $0x158] sm:$0xff]   ;;  %v1824_v57 = vld [vmem:[%s2299_s4 + $0x160] sm:$0xff]  }
  0xf6   : > { %v649_v22 = vmax.f32 %v463_v13, 0.0  ;;  %v651_v11 = vmax.f32 %v516_v8, 0.0  ;;  %v1822_v51 = vld [vmem:[%s2299_s4 + $0x118] sm:$0xff]   ;;  %v1826_v1 = vld [vmem:[%s2299_s4 + $0x120] sm:$0xff]  }
  0xf7   : > { %v664_v26 = vpack.c.bf16 %v648_v9, %v640_v0  ;;  %v666_v27 = vpack.c.bf16 %v650_v18, %v642_v2  ;;  %v1827_v2 = vld [vmem:[%s2299_s4 + $0x1a0] sm:$0xff]  }
  0xf8   : > { %1712 = vmatpush3.bf16.msra.mxu0 %v1814_v7  ;;  %1740 = vmatpush3.bf16.msra.mxu1 %v1815_v12  ;;  %v665_v28 = vpack.c.bf16 %v649_v22, %v641_v14  ;;  %v667_v31 = vpack.c.bf16 %v651_v11, %v643_v15  ;;  %v552_v32 = vpop.f32.mrb[8].mxu0  ;;  %v605_v35 = vpop.f32.mrb[8].mxu1  ;;  %v1828_v12 = vld [vmem:[%s2299_s4 + $0x168] sm:$0xff]  }
  0xf9   : > { %1713 = vmatprep.subr.bf16.mxu0 %v1816_v16  ;;  %1741 = vmatprep.subr.bf16.mxu1 %v1817_v17  ;;  %v553_v37 = vadd.f32 %v552_v32, %v2144_v20  ;;  %v554_v38 = vpop.f32.mrb[9].mxu0  ;;  %v606_v39 = vadd.f32 %v605_v35, %v2147_v10  ;;  %v607_v40 = vpop.f32.mrb[9].mxu1  ;;  %v1829_v14 = vld [vmem:[%s2299_s4 + $0x1e8] sm:$0xff]  }
  0xfa   : > { %1231 = vmatprep.mubr.bf16.mxu0 %v665_v28  ;;  %1280 = vmatprep.mubr.bf16.mxu1 %v667_v31  ;;  %v555_v41 = vadd.f32 %v554_v38, %v2150_v23  ;;  %v556_v42 = vpop.f32.mrb[10].mxu0  ;;  %v608_v43 = vadd.f32 %v607_v40, %v2153_v19  ;;  %v609_v44 = vpop.f32.mrb[10].mxu1  ;;  %v1830_v31 = vld [vmem:[%s2299_s4 + $0x128] sm:$0xff]  }
  0xfb   : > { %1232 = vmatmul.mubr.bf16.gmra.mrb[20].mxu0 %v664_v26  ;;  %v628_v45 = vmax.f32 %v553_v37, 0.0  ;;  %1281 = vmatmul.mubr.bf16.gmra.mrb[20].mxu1 %v666_v27  ;;  %v557_v46 = vadd.f32 %v556_v42, %v2144_v20  ;;  %v630_v47 = vmax.f32 %v606_v39, 0.0  ;;  %v558_v48 = vpop.f32.mrb[11].mxu0  ;;  %v610_v49 = vadd.f32 %v609_v44, %v2147_v10  ;;  %v611_v50 = vpop.f32.mrb[11].mxu1  ;;  %v1831_v32 = vld [vmem:[%s2299_s4 + $0x1a8] sm:$0xff]   ;;  %v1833_v37 = vld [vmem:[%s2299_s4 + $0x1f0] sm:$0xff]  }
  0xfc   : > { %1714 = vmatpush3.bf16.msra.mxu0 %v1818_v29  ;;  %1742 = vmatpush3.bf16.msra.mxu1 %v1819_v30  ;;  %v629_v53 = vmax.f32 %v555_v41, 0.0  ;;  %v559_v54 = vadd.f32 %v558_v48, %v2150_v23  ;;  %v631_v55 = vmax.f32 %v608_v43, 0.0  ;;  %v612_v56 = vadd.f32 %v611_v50, %v2153_v19  ;;  %v1838_v48 = vld [vmem:[%s2299_s4 + $0x138] sm:$0xff]  }
  0xfd   : > { %1715 = vmatprep.subr.bf16.mxu0 %v1820_v5  ;;  %1743 = vmatprep.subr.bf16.mxu1 %v1821_v36  ;;  %v636_v59 = vmax.f32 %v557_v46, 0.0  ;;  %v638_v60 = vmax.f32 %v610_v49, 0.0  ;;  %v1836_v46 = vld [vmem:[%s2299_s4 + $0x178] sm:$0xff]  }
  0xfe   : > { %v637_v61 = vmax.f32 %v559_v54, 0.0  ;;  %v639_v62 = vmax.f32 %v612_v56, 0.0  ;;  %v1839_v49 = vld [vmem:[%s2299_s4 + $0x1b8] sm:$0xff]  }
  0xff   : > { %v2187_v63 = vpack.c.bf16 %v636_v59, %v628_v45  ;;  %v2189_v0 = vpack.c.bf16 %v638_v60, %v630_v47  ;;  %v1837_v47 = vld [vmem:[%s2299_s4 + $0x1f8] sm:$0xff]  }
 0x100   : > { %1716 = vmatpush3.bf16.msra.mxu0 %v1822_v51  ;;  %1744 = vmatpush3.bf16.msra.mxu1 %v1823_v52  ;;  %v661_v3 = vpack.c.bf16 %v637_v61, %v629_v53  ;;  %v663_v4 = vpack.c.bf16 %v639_v62, %v631_v55  ;;  %v562_v6 = vpop.f32.mrb[12].mxu0  ;;  %v615_v7 = vpop.f32.mrb[12].mxu1  ;;  %v1586_v52 = vld [vmem:[%s2300_s5] ss:$0 sm:$0xff] }
 0x101   : > { %1717 = vmatprep.subr.bf16.mxu0 %v1824_v57  ;;  %1745 = vmatprep.subr.bf16.mxu1 %v1825_v58  ;;  %v563_v13 = vadd.f32 %v562_v6, %v2144_v20  ;;  %v564_v15 = vpop.f32.mrb[13].mxu0  ;;  %v616_v8 = vadd.f32 %v615_v7, %v2147_v10  ;;  %v617_v9 = vpop.f32.mrb[13].mxu1 }
 0x102   : > { %1321 = vmatprep.mubr.bf16.mxu0 %v661_v3  ;;  %v565_v16 = vadd.f32 %v564_v15, %v2150_v23  ;;  %1370 = vmatprep.mubr.bf16.mxu1 %v663_v4  ;;  %v566_v17 = vpop.f32.mrb[14].mxu0  ;;  %v618_v18 = vadd.f32 %v617_v9, %v2153_v19  ;;  %v619_v22 = vpop.f32.mrb[14].mxu1 }
 0x103   : > { %v644_v11 = vmax.f32 %v563_v13, 0.0  ;;  %v567_v26 = vadd.f32 %v566_v17, %v2144_v20  ;;  %v646_v27 = vmax.f32 %v616_v8, 0.0  ;;  %v568_v28 = vpop.f32.mrb[15].mxu0  ;;  %v620_v29 = vadd.f32 %v619_v22, %v2147_v10  ;;  %v621_v30 = vpop.f32.mrb[15].mxu1  ;;  %v1832_v10 = vld [vmem:[%s2299_s4 + $0x170] sm:$0xff]  }
 0x104   : > { %1718 = vmatpush3.bf16.msra.mxu0 %v1826_v1  ;;  %1746 = vmatpush3.bf16.msra.mxu1 %v1827_v2  ;;  %v645_v35 = vmax.f32 %v565_v16, 0.0  ;;  %v569_v5 = vadd.f32 %v568_v28, %v2150_v23  ;;  %v647_v36 = vmax.f32 %v618_v18, 0.0  ;;  %v622_v20 = vadd.f32 %v621_v30, %v2153_v19  ;;  %v1834_v23 = vld [vmem:[%s2299_s4 + $0x130] sm:$0xff]  }
 0x105   : > { %1719 = vmatprep.subr.bf16.mxu0 %v1828_v12  ;;  %1747 = vmatprep.subr.bf16.mxu1 %v1829_v14  ;;  %v652_v38 = vmax.f32 %v567_v26, 0.0  ;;  %v654_v39 = vmax.f32 %v620_v29, 0.0  ;;  %v1835_v19 = vld [vmem:[%s2299_s4 + $0x1b0] sm:$0xff]  }
 0x106   : > { %v653_v40 = vmax.f32 %v569_v5, 0.0  ;;  %v655_v41 = vmax.f32 %v622_v20, 0.0 }
 0x107   : > { %v668_v42 = vpack.c.bf16 %v652_v38, %v644_v11  ;;  %v670_v43 = vpack.c.bf16 %v654_v39, %v646_v27  ;;  %v1402_v39 = vpop.permute.xlu0 %1401 }
 0x108   : > { %1720 = vmatpush3.bf16.msra.mxu0 %v1830_v31  ;;  %1748 = vmatpush3.bf16.msra.mxu1 %v1831_v32  ;;  %v669_v44 = vpack.c.bf16 %v653_v40, %v645_v35  ;;  %v671_v45 = vpack.c.bf16 %v655_v41, %v647_v36 }
 0x109   : > { %1721 = vmatprep.subr.bf16.mxu0 %v1832_v10  ;;  %1749 = vmatprep.subr.bf16.mxu1 %v1833_v37 }
 0x10c   : > { %1722 = vmatpush3.bf16.msra.mxu0 %v1834_v23  ;;  %1750 = vmatpush3.bf16.msra.mxu1 %v1835_v19 }
 0x10d   : > { %1723 = vmatprep.subr.bf16.mxu0 %v1836_v46  ;;  %1751 = vmatprep.subr.bf16.mxu1 %v1837_v47 }
 0x110   : > { %1724 = vmatpush3.bf16.msra.mxu0 %v1838_v48  ;;  %1752 = vmatpush3.bf16.msra.mxu1 %v1839_v49 }
 0x113   : > { %1322 = vmatmul.mubr.bf16.vlgmr.msra.gmra.mrb[24].mxu0 %v2187_v63  ;;  %1371 = vmatmul.mubr.bf16.vlgmr.msra.gmra.mrb[24].mxu1 %v2189_v0 }
 0x114   : > { %1329 = vmatprep.mubr.bf16.mxu0 %v669_v44  ;;  %1378 = vmatprep.mubr.bf16.mxu1 %v671_v45 }
 0x11b   : > { %1330 = vmatmul.mubr.bf16.gmra.mrb[28].mxu0 %v668_v42  ;;  %1379 = vmatmul.mubr.bf16.gmra.mrb[28].mxu1 %v670_v43 }
 0x1c6   : > { %v1669_v50 = vpop.f32.mrb[16].mxu0  ;;  %v1697_v51 = vpop.f32.mrb[16].mxu1 }
 0x1c7   : > { %v1670_v53 = vpop.f32.mrb[17].mxu0  ;;  %v1698_v54 = vpop.f32.mrb[17].mxu1 }
 0x1c8   : > { %v1671_v55 = vadd.f32 %v1670_v53, %v1669_v50  ;;  %v1699_v56 = vadd.f32 %v1698_v54, %v1697_v51  ;;  %v1672_v57 = vpop.f32.mrb[18].mxu0  ;;  %v1700_v58 = vpop.f32.mrb[18].mxu1 }
 0x1c9   : > { %v1673_v59 = vpop.f32.mrb[19].mxu0  ;;  %v1701_v60 = vpop.f32.mrb[19].mxu1 }
 0x1ca   : > { %v1226_v61 = vadd.f32 %v1671_v55, %v1586_v52  ;;  %v1674_v62 = vadd.f32 %v1673_v59, %v1672_v57  ;;  %v1702_v63 = vadd.f32 %v1701_v60, %v1700_v58 }
 0x1cc   : > { %v1275_v0 = vadd.f32 %v1699_v56, %v1226_v61  ;;  %v1229_v1 = vadd.f32 %v1674_v62, %v1586_v52 }
 0x1ce   : > { %v1278_v2 = vadd.f32 %v1702_v63, %v1229_v1  ;;  %v1675_v3 = vpop.f32.mrb[20].mxu0  ;;  %v1703_v4 = vpop.f32.mrb[20].mxu1 }
 0x1cf   : > { %v1676_v6 = vpop.f32.mrb[21].mxu0  ;;  %v1704_v7 = vpop.f32.mrb[21].mxu1 }
 0x1d0   : > { %v1677_v12 = vadd.f32 %v1676_v6, %v1675_v3  ;;  %v1678_v14 = vpop.f32.mrb[22].mxu0  ;;  %v1705_v13 = vadd.f32 %v1704_v7, %v1703_v4  ;;  %v1706_v15 = vpop.f32.mrb[22].mxu1 }
 0x1d1   : > { %v1679_v8 = vpop.f32.mrb[23].mxu0  ;;  %v1707_v9 = vpop.f32.mrb[23].mxu1 }
 0x1d2   : > { %v1234_v16 = vadd.f32 %v1677_v12, %v1586_v52  ;;  %v1680_v17 = vadd.f32 %v1679_v8, %v1678_v14  ;;  %v1708_v18 = vadd.f32 %v1707_v9, %v1706_v15  ;;  %v1856_v9 = vld [vmem:[%s1957_s26] sm:$0xff] }
 0x1d4   : > { %v1237_v22 = vadd.f32 %v1680_v17, %v1586_v52  ;;  %v1283_v11 = vadd.f32 %v1705_v13, %v1234_v16 }
 0x1d6   : > { %v1286_v26 = vadd.f32 %v1708_v18, %v1237_v22 }
 0x1e6   : > { %v1725_v27 = vpop.f32.mrb[24].mxu0  ;;  %v1753_v28 = vpop.f32.mrb[24].mxu1 }
 0x1e7   : > { %v1726_v29 = vpop.f32.mrb[25].mxu0  ;;  %v1754_v30 = vpop.f32.mrb[25].mxu1 }
 0x1e8   : > { %v1727_v31 = vadd.f32 %v1726_v29, %v1725_v27  ;;  %v1755_v32 = vadd.f32 %v1754_v30, %v1753_v28  ;;  %v1728_v35 = vpop.f32.mrb[26].mxu0  ;;  %v1756_v5 = vpop.f32.mrb[26].mxu1 }
 0x1e9   : > { %v1729_v36 = vpop.f32.mrb[27].mxu0  ;;  %v1757_v20 = vpop.f32.mrb[27].mxu1 }
 0x1ea   : > { %v1324_v10 = vadd.f32 %v1727_v31, %v1275_v0  ;;  %v1730_v37 = vadd.f32 %v1729_v36, %v1728_v35  ;;  %v1758_v38 = vadd.f32 %v1757_v20, %v1756_v5 }
 0x1ec   : > { %v1373_v40 = vadd.f32 %v1755_v32, %v1324_v10  ;;  %v1327_v41 = vadd.f32 %v1730_v37, %v1278_v2 }
 0x1ee   : > { %1840 = vtanh.f32 %v1373_v40  ;;  %v1376_v42 = vadd.f32 %v1758_v38, %v1327_v41  ;;  %v1731_v43 = vpop.f32.mrb[28].mxu0  ;;  %v1759_v23 = vpop.f32.mrb[28].mxu1  ;;  %v1404_v19 = vmul.f32 %v1402_v39, %v1373_v40  ;;  %v1858_v38 = vld [vmem:[%s1957_s26 + $0x18] sm:$0xff] }
 0x1ef   : > { %v1732_v44 = vpop.f32.mrb[29].mxu0  ;;  %v1760_v45 = vpop.f32.mrb[29].mxu1 }
 0x1f0   : > { %v1733_v46 = vadd.f32 %v1732_v44, %v1731_v43  ;;  %v1734_v47 = vpop.f32.mrb[30].mxu0  ;;  %1424 = vrot.lane.b32.xlu1 %v1404_v19, %s1870_s17  ;;  %v1761_v48 = vadd.f32 %v1760_v45, %v1759_v23  ;;  %v1762_v49 = vpop.f32.mrb[30].mxu1  ;;  %v1405_v55 = vmul.f32 %v1402_v39, %v1376_v42  ;;  %1842 = vtanh.f32 %v1376_v42  ;;  %v1859_v42 = vld [vmem:[%s1957_s26 + $0x10] sm:$0xff] }
 0x1f1   : > { %v1735_v50 = vpop.f32.mrb[31].mxu0  ;;  %v1763_v51 = vpop.f32.mrb[31].mxu1 }
 0x1f2   : > { %v1332_v52 = vadd.f32 %v1733_v46, %v1283_v11  ;;  %v1736_v53 = vadd.f32 %v1735_v50, %v1734_v47  ;;  %v1764_v54 = vadd.f32 %v1763_v51, %v1762_v49 }
 0x1f4   : > { %v1335_v56 = vadd.f32 %v1736_v53, %v1286_v26  ;;  %v1381_v57 = vadd.f32 %v1761_v48, %v1332_v52  ;;  %1426 = vrot.lane.b32.xlu1 %v1405_v55, %s1870_s17  ;;  %v1857_v26 = vld [vmem:[%s1957_s26 + $0x8] sm:$0xff] }
 0x1f6   : > { %v1384_v58 = vadd.f32 %v1764_v54, %v1335_v56  ;;  %1844 = vtanh.f32 %v1381_v57  ;;  %v1406_v14 = vmul.f32 %v1402_v39, %v1381_v57 }
 0x1f8   : > { %v1841_v59 = vpop.eup %1840  ;;  %1846 = vtanh.f32 %v1384_v58  ;;  %v1407_v63 = vmul.f32 %v1402_v39, %v1384_v58 }
 0x1f9   : > { %v1397_v60 = vmul.f32 %v1841_v59, %v1961_v21 }
 0x1fa   : > { %v1843_v62 = vpop.eup %1842 }
 0x1fb   : > { %v1452_v61 = vsel %vm405_vm0, %v1397_v60, 0.0  ;;  %v1398_v0 = vmul.f32 %v1843_v62, %v1961_v21  ;;  %v1408_v13 = vmul.f32 1.442695, %v1397_v60 }
 0x1fc   : > { %1453 = vadd.xlane.f32.xlu0 %v1452_v61 }
 0x1fd   : > { %v1455_v2 = vsel %vm405_vm0, %v1398_v0, 0.0  ;;  %1848 = vpow2.f32 %v1408_v13  ;;  %v1410_v15 = vmul.f32 1.442695, %v1398_v0 }
 0x1ff   : > { %1850 = vpow2.f32 %v1410_v15 }
 0x200   : > { %v1845_v1 = vpop.eup %1844 }
 0x201   : > { %v1399_v3 = vmul.f32 %v1845_v1, %v1961_v21 }
 0x202   : > { %v1847_v4 = vpop.eup %1846 }
 0x203   : > { %v1458_v6 = vsel %vm405_vm0, %v1399_v3, 0.0  ;;  %v1400_v7 = vmul.f32 %v1847_v4, %v1961_v21 }
 0x205   : > { %v1461_v12 = vsel %vm405_vm0, %v1400_v7, 0.0  ;;  %v1414_v5 = vmul.f32 1.442695, %v1400_v7 }
 0x207   : > { %v1849_v8 = vpop.eup %1848  ;;  %1852 = vpow2.f32 %v1414_v5 }
 0x208   : > { %v1416_v16 = vmul.f32 %v1856_v9, %v1849_v8 }
 0x209   : > { %v1851_v17 = vpop.eup %1850 }
 0x20a   : > { %v1417_v27 = vmul.f32 %v1857_v26, %v1851_v17 }
 0x211   : > { %v1853_v20 = vpop.eup %1852 }
 0x212   : > { %1430 = vrot.lane.b32.xlu0 %v1407_v63, %s1870_s17  ;;  %v1419_v39 = vmul.f32 %v1858_v38, %v1853_v20 }
 0x218   : > { %1456 = vadd.xlane.f32.xlu1 %v1455_v2 }
 0x21c   : > { %1459 = vadd.xlane.f32.xlu1 %v1458_v6 }
 0x220   : > { %1462 = vadd.xlane.f32.xlu1 %v1461_v12 }
 0x231   : > { %1428 = vrot.lane.b32.xlu1 %v1406_v14, %s1870_s17 }
 0x262   : > { %v1425_v18 = vpop.permute.xlu1 %1424 }
 0x263   : > { %v1436_v22 = vadd.f32 %v1425_v18, %v1416_v16 }
 0x265   : > { %v1440_v11 = vmul.f32 %v1436_v22, %v1961_v21 }
 0x266   : > { %v1427_v28 = vpop.permute.xlu1 %1426 }
 0x267   : > { %v1444_v29 = vadd.f32 %v1440_v11, %v1965_v24  ;;  %v1437_v30 = vadd.f32 %v1427_v28, %v1417_v27  ;;  %v1412_v24 = vmul.f32 1.442695, %v1399_v3 }
 0x269   : > { %1448 = vst.msk [vmem:[%s2265_s20] sm:$0xff] %vm405_vm0, %v1444_v29  ;;  %v1441_v31 = vmul.f32 %v1437_v30, %v1961_v21  ;;  %1854 = vpow2.f32 %v1412_v24 }
 0x26b   : > { %v1445_v32 = vadd.f32 %v1441_v31, %v1967_v25 }
 0x26d   : > { %1449 = vst.msk [vmem:[%s2265_s20 + $0x8] sm:$0xff] %vm405_vm0, %v1445_v32 }
 0x273   : > { %v1855_v37 = vpop.eup %1854 }
 0x274   : > { %v1418_v43 = vmul.f32 %v1859_v42, %v1855_v37 }
 0x289   : > { %v1454_v35 = vpop.xlane.xlu0 %1453 }
 0x28a   : > { %1465 = vst.msk [vmem:[%s294_s25] sm:$0xff] %vm1464_vm1, %v1454_v35 }
 0x28d   : > { %v1431_v10 = vpop.permute.xlu0 %1430 }
 0x28e   : > { %v1439_v41 = vadd.f32 %v1431_v10, %v1419_v39 }
 0x290   : > { %v1443_v44 = vmul.f32 %v1439_v41, %v1961_v21 }
 0x292   : > { %v1447_v47 = vadd.f32 %v1443_v44, %v1983_v34 }
 0x294   : > { %1451 = vst.msk [vmem:[%s2265_s20 + $0x18] sm:$0xff] %vm405_vm0, %v1447_v47 }
 0x2a5   : > { %v1457_v36 = vpop.xlane.xlu1 %1456 }
 0x2a6   : > { %1466 = vst.msk [vmem:[%s294_s25 + $0x8] sm:$0xff] %vm1464_vm1, %v1457_v36 }
 0x2a9   : > { %v1460_v25 = vpop.xlane.xlu1 %1459 }
 0x2aa   : > { %1467 = vst.msk [vmem:[%s294_s25 + $0x10] sm:$0xff] %vm1464_vm1, %v1460_v25 }
 0x2ad   : > { %v1463_v40 = vpop.xlane.xlu1 %1462 }
 0x2ae   : > { %1468 = vst.msk [vmem:[%s294_s25 + $0x18] sm:$0xff] %vm1464_vm1, %v1463_v40 }
 0x2b1   : > { %v1429_v23 = vpop.permute.xlu1 %1428 }
 0x2b2   : > { %v1438_v19 = vadd.f32 %v1429_v23, %v1418_v43 }
 0x2b4   : > { %v1442_v45 = vmul.f32 %v1438_v19, %v1961_v21 }
 0x2b6   : > { %v1446_v46 = vadd.f32 %v1442_v45, %v1981_v33 }
 0x2b8   : > { %1450 = vst.msk [vmem:[%s2265_s20 + $0x10] sm:$0xff] %vm405_vm0, %v1446_v46 }
 0x2b9 PF: > { %s18_s24 = sadd.s32 1, %s1866_s24  }
 0x2ba   : > { %p15_p4 = scmp.ge.s32.totalorder %s18_s24, 4  }
 0x2bc   :  { %17 = sbr.rel (!%p15_p4) target bundleno = 1 (0x1), region = 86 }

</bundles_post_ra>
